<compile_context>
chip_gen: v7x
topology: tpu7x:2x2x1
jax: 0.10.0
libtpu: 0.0.40
codegen_flags: <defaults>
</compile_context>

<pallas_src>
import jax
import jax.numpy as jnp
from jax.experimental import pallas as pl
from jax.experimental.pallas import tpu as pltpu

VOCAB_SIZE = 64
EMBED_DIM = 128        # lane-aligned embedding dim (multiple of 128)
MAX_TOK_BLOCK = 4096   # max tokens gathered per grid step (2048-4096 per review;
                       # ~8192 is also fine on v7x if the grid stays >= 2 and even)


def _round_up(x, m):
    return ((x + m - 1) // m) * m


def _embedding_gather_kernel(idx_ref, table_ref, out_ref):
    """One-hot-matmul gather of a tile of embedding rows.

    idx_ref   : VMEM ref, (1, TB) int32 token ids for this tile (lane-dense)
    table_ref : VMEM ref, (V, D) float32 full embedding table (constant block,
                stays resident across grid steps)
    out_ref   : VMEM ref, (TB, D) float32 output tile
    """
    idx = idx_ref[...]                                        # (1, TB)
    v = table_ref.shape[0]
    tb = idx.shape[1]

    # One-hot with vocab on the sublane axis: onehot[v, t] = (v == idx[t]).
    vocab_iota = jax.lax.broadcasted_iota(jnp.int32, (v, tb), 0)
    onehot = (vocab_iota == idx).astype(table_ref.dtype)      # (V, TB)

    # Contract the V axis of both operands on the MXU: result[t, d].
    # HIGHEST precision keeps the gather bit-exact (no bf16 operand truncation).
    out_ref[...] = jax.lax.dot_general(
        onehot,
        table_ref[...],
        dimension_numbers=(((0,), (0,)), ((), ())),
        preferred_element_type=jnp.float32,
        precision=jax.lax.Precision.HIGHEST,
    ).astype(out_ref.dtype)


def embedding_forward(indices, table, *, max_tok_block=MAX_TOK_BLOCK):
    """Pallas TPU implementation of Word2VecModel.forward.

    indices : int array of arbitrary shape (e.g. (B, S))
    table   : float32 array (V, D)
    returns : float32 array indices.shape + (D,)  (nn.Embedding semantics)
    """
    orig_shape = indices.shape
    flat_idx = indices.reshape(-1).astype(jnp.int32)
    n_tok = flat_idx.shape[0]
    v, d = table.shape

    # Adaptive token tile: big inputs use large HBM-roofline tiles, tiny inputs
    # collapse to a single small tile (no padding up to the big block).
    tok_block = max(8, min(max_tok_block, _round_up(n_tok, 8)))
    n_pad = pl.cdiv(n_tok, tok_block) * tok_block
    if n_pad != n_tok:
        flat_idx = jnp.pad(flat_idx, (0, n_pad - n_tok))  # pad ids gather row 0, sliced off below
    num_tiles = n_pad // tok_block
    idx2d = flat_idx.reshape(num_tiles, tok_block)        # lane-dense id layout

    cost = pl.CostEstimate(
        flops=2 * n_pad * v * d,
        transcendentals=0,
        bytes_accessed=n_pad * (d + 1) * 4 + v * d * 4,
    )

    # TODO(synk): for production vocab sizes where V*D*4 exceeds scoped VMEM
    # (notably v7x's 64 MiB / 32 MiB scoped), switch the table to
    # memory_space=pl.ANY with a scalar-prefetch-driven row gather (pl.Element
    # index_map or manual double-buffered pltpu.make_async_copy) instead of the
    # full-table-resident one-hot path (whose MXU work also scales as O(T*V*D)).
    out_flat = pl.pallas_call(
        _embedding_gather_kernel,
        out_shape=jax.ShapeDtypeStruct((n_pad, d), table.dtype),
        grid_spec=pltpu.PrefetchScalarGridSpec(
            num_scalar_prefetch=0,
            grid=(num_tiles,),
            in_specs=[
                # Per-step token-id tile: (1, tok_block) is one contiguous DMA.
                pl.BlockSpec((1, tok_block), lambda i: (i, 0)),
                # Full embedding table; constant block index -> fetched once,
                # stays VMEM-resident for all grid steps.
                pl.BlockSpec((v, d), lambda i: (0, 0)),
            ],
            out_specs=pl.BlockSpec((tok_block, d), lambda i: (i, 0)),
        ),
        compiler_params=pltpu.CompilerParams(
            # Disjoint output tiles per step: truly parallel axis
            # (lets v7x shard the grid across both TensorCores).
            dimension_semantics=("parallel",),
        ),
        cost_estimate=cost,
    )(idx2d, table)

    out_flat = out_flat[:n_tok]
    return out_flat.reshape(*orig_shape, d)


if __name__ == "__main__":
    key = jax.random.PRNGKey(0)
    k_table, k_idx = jax.random.split(key)

    # Deterministic "parameters": nn.Embedding default init is N(0, 1).
    table = jax.random.normal(k_table, (VOCAB_SIZE, EMBED_DIM), dtype=jnp.float32)

    # Example inputs: batch=2, seq=8 token ids (arbitrary shape; padding handled).
    indices = jax.random.randint(k_idx, (2, 8), 0, VOCAB_SIZE, dtype=jnp.int32)

    out = embedding_forward(indices, table)
    out = jax.block_until_ready(out)

    # Sanity check against plain-JAX gather (HIGHEST precision -> bit-exact rows).
    ref = jnp.take(table, indices, axis=0)
    assert out.shape == (2, 8, EMBED_DIM), out.shape
    assert jnp.allclose(out, ref), "mismatch vs reference gather"

    print("KERNEL_OK")
</pallas_src>

<mosaic_0001>
module attributes {stable_mosaic.version = 11 : i64} {
  func.func @_embedding_gather_kernel(%arg0: i32, %arg1: memref<1x16xi32, #tpu.memory_space<vmem>>, %arg2: memref<64x128xf32, #tpu.memory_space<vmem>>, %arg3: memref<16x128xf32, #tpu.memory_space<vmem>>) attributes {dimension_semantics = [#tpu.dimension_semantics<parallel>], iteration_bounds = array<i64: 1>, scalar_prefetch = 0 : i64, scratch_operands = 0 : i64, tpu.core_type = #tpu.core_type<tc>, window_params = [{transform_indices = @transform_0, window_bounds = array<i64: 1, 16>}, {pipeline_mode = #tpu.pipeline_mode<synchronous>, transform_indices = @transform_1, window_bounds = array<i64: 64, 128>}, {transform_indices = @transform_2, window_bounds = array<i64: 16, 128>}]} {
    %c0 = arith.constant 0 : index
    %c0_0 = arith.constant 0 : index
    %0 = vector.load %arg1[%c0, %c0_0] : memref<1x16xi32, #tpu.memory_space<vmem>>, vector<1x16xi32>
    %1 = tpu.iota {dimensions = array<i32: 0>} : vector<64x16xi32>
    %2 = vector.broadcast %0 : vector<1x16xi32> to vector<64x16xi32>
    %3 = arith.cmpi eq, %1, %2 : vector<64x16xi32>
    %4 = arith.extui %3 : vector<64x16xi1> to vector<64x16xi32>
    %5 = arith.sitofp %4 : vector<64x16xi32> to vector<64x16xf32>
    %c0_1 = arith.constant 0 : index
    %c0_2 = arith.constant 0 : index
    %6 = vector.load %arg2[%c0_1, %c0_2] : memref<64x128xf32, #tpu.memory_space<vmem>>, vector<64x128xf32>
    %cst = arith.constant dense<0.000000e+00> : vector<16x128xf32>
    %7 = tpu.matmul %5, %6, %cst {dimension_numbers = #tpu.dot_dimension_numbers<[0], [0], [1], [1], [0, 1, 1, 1], [], []>, precision = #tpu.contract_precision<fp32>} : vector<64x16xf32>, vector<64x128xf32>, vector<16x128xf32> -> vector<16x128xf32>
    %c0_3 = arith.constant 0 : index
    %c0_4 = arith.constant 0 : index
    %8 = vector.load %arg3[%c0_3, %c0_4] : memref<16x128xf32, #tpu.memory_space<vmem>>, vector<16x128xf32>
    tpu.vector_store %arg3[%c0_3, %c0_4], %7 {strides = array<i32>} : memref<16x128xf32, #tpu.memory_space<vmem>>, vector<16x128xf32>,
    return
  }
  func.func @transform_0(%arg0: i32) -> (i32, i32) {
    %c0_i32 = arith.constant 0 : i32
    %c0_i32_0 = arith.constant 0 : i32
    return %arg0, %c0_i32 : i32, i32
  }
  func.func @transform_1(%arg0: i32) -> (i32, i32) {
    %c0_i32 = arith.constant 0 : i32
    %c0_i32_0 = arith.constant 0 : i32
    %c0_i32_1 = arith.constant 0 : i32
    return %c0_i32, %c0_i32_0 : i32, i32
  }
  func.func @transform_2(%arg0: i32) -> (i32, i32) {
    %c0_i32 = arith.constant 0 : i32
    %c0_i32_0 = arith.constant 0 : i32
    return %arg0, %c0_i32 : i32, i32
  }
}

</mosaic_0001>

<bundles_post_ra>
// kernel: tpu_custom_call.1
= control target key start
LH: loop header
LB: loop body
LE: loop exit
PB: predicated region body
PF: predicated region fallthrough
CT: control target
= control target key end

     0   :  { %7 = vsyncpa [#allocation3], 0  ;;  %s1234_s0 = inlined_call_operand.hbm [shape: s32[1,16], index: 0, kind: input, shape index: {}]   ;;  %s1235_s1 = inlined_call_operand.hbm [shape: f32[64,128], index: 1, kind: input, shape index: {}]   ;;  %s1236_s2 = inlined_call_operand.hbm [shape: f32[16,128], index: 2, kind: output, shape index: {}]  }
   0x1   :  { %8 = vsyncpa [#allocation6], 0 }
   0x2   :  { %9 = vsyncpa [#allocation4], 0  ;;  %s1090_s9 = smov [#allocation2]   ;;  %s1091_s11 = smov [#allocation5]  }
   0x3   :  { %s16_s10 = sshll.u32 %s1090_s9, 4  ;;  %s25_s12 = sshll.u32 %s1091_s11, 4  ;;  %s17_s10 = int_to_ptr.vmem [resolvable:$true] %s16_s10  ;;  %s1111_s12 = int_to_ptr.vmem [resolvable:$true] %s25_s12 }
   0x4   :  { %s1018_s15 = scalar_lea.hbm %s1234_s0, 16 }
   0x5   :  { %p1019_p0 = scmp.ne.s32.totalorder %s1234_s0, %s1018_s15  ;;  %p1022_p1 = scmp.lt.u32.totalorder %s1018_s15, %s1234_s0 }
   0x7   :  { %p1024_p2 = pnand %p1022_p1, %p1019_p0 }
   0x9   :  { %1027 = shalt.err (!%p1024_p2)
}
   0xa   :  { %s1028_s20 = scalar_lea.vmem %s17_s10, 16  ;;  %s1032_s21 = scalar_lea.vmem %s17_s10, 32 }
   0xb   :  { %p1029_p3 = scmp.ne.s32.totalorder %s17_s10, %s1028_s20  ;;  %p1033_p4 = scmp.lt.s32.totalorder %s17_s10, %s17_s10 }
   0xc   :  { %p1034_p5 = scmp.lt.s32.totalorder %s1032_s21, %s1028_s20 }
   0xe   :  { %p1035_p6 = por %p1034_p5, %p1033_p4 }
  0x10   :  { %p1036_p7 = pnand %p1035_p6, %p1029_p3 }
  0x12   :  { %1039 = shalt.err (!%p1036_p7)
}
  0x13   :  { %19 = dma.hbm_to_vmem [thread:$0]  %s1234_s0, 16, %s17_s10, [#allocation3]  }
  0x14   :  { %s1040_s26 = scalar_lea.hbm %s1235_s1, 1024 }
  0x15   :  { %p1041_p8 = scmp.ne.s32.totalorder %s1235_s1, %s1040_s26  ;;  %p1044_p9 = scmp.lt.u32.totalorder %s1040_s26, %s1235_s1 }
  0x17   :  { %p1046_p10 = pnand %p1044_p9, %p1041_p8 }
  0x19   :  { %1049 = shalt.err (!%p1046_p10)
}
  0x1a   :  { %s1050_s3 = scalar_lea.vmem %s1111_s12, 1024  ;;  %p1055_p12 = scmp.lt.s32.totalorder %s1111_s12, %s1111_s12 }
  0x1b   :  { %p1051_p11 = scmp.ne.s32.totalorder %s1111_s12, %s1050_s3  ;;  %p1056_p13 = scmp.lt.s32.totalorder %s1050_s3, %s1050_s3 }
  0x1d   :  { %p1057_p0 = por %p1056_p13, %p1055_p12 }
  0x1f   :  { %p1058_p1 = pnand %p1057_p0, %p1051_p11 }
  0x21   :  { %1061 = shalt.err (!%p1058_p1)
}
  0x22   :  { %s1092_s0 = smov 128   ;;  %s1093_s4 = smov 8  }
  0x23   :  { %31 = dma.hbm_to_vmem [thread:$0]  %s1235_s1, 1024, %s1111_s12, [#allocation6], %s1092_s0, %s1092_s0, %s1093_s4  }
  0x24   :  { %1084 = dma.done.wait [#allocation3], 16  }
  0x25   :  { %1085 = vsyncadd [#allocation3], 4294967280 }
  0x26   :  { %1086 = dma.done.wait [#allocation6], 1024  }
  0x27   :  { %1087 = vsyncadd [#allocation6], 4294966272  ;;  %v39_v0 = vlaneseq  ;;  %v1148_v3 = vld [vmem:[#allocation2] ss:$0 sm:$0xff]  ;;  %v76_v5 = vld [vmem:[#allocation5] sm:$0xff]  ;;  %v1094_v6 = vmov 0.0  }
  0x28   :  { %v77_v8 = vld [vmem:[#allocation5 + $0x8] sm:$0xff]  ;;  %v78_v9 = vld [vmem:[#allocation5 + $0x10] sm:$0xff]  ;;  %v79_v10 = vld [vmem:[#allocation5 + $0x18] sm:$0xff]  ;;  %v124_v15 = vand.u32 4294901760, %v76_v5  ;;  %vm116_vm8 = vcmask 523264   ;;  %s1095_s1 = smov [#allocation7]  }
  0x29   :  { %v1145_v1 = vshrl.u32 %v39_v0, 7  ;;  %v80_v13 = vld [vmem:[#allocation5 + $0x20] sm:$0xff]  ;;  %v81_v14 = vld [vmem:[#allocation5 + $0x28] sm:$0xff]  ;;  %v127_v16 = vand.u32 4294901760, %v77_v8  ;;  %v130_v17 = vand.u32 4294901760, %v78_v9  ;;  %v133_v18 = vand.u32 4294901760, %v79_v10 }
  0x2a   :  { %v136_v21 = vand.u32 4294901760, %v80_v13  ;;  %v139_v22 = vand.u32 4294901760, %v81_v14  ;;  %v82_v25 = vld [vmem:[#allocation5 + $0x30] sm:$0xff]  ;;  %v83_v26 = vld [vmem:[#allocation5 + $0x38] sm:$0xff]  ;;  %v1164_v27 = vsub.f32 %v76_v5, %v124_v15  ;;  %s710_s7 = sshll.u32 %s1095_s1, 4  ;;  %s711_s7 = int_to_ptr.vmem [resolvable:$true] %s710_s7 }
  0x2b   :  { %v41_v2 = vadd.s32 8, %v1145_v1  ;;  %v42_v4 = vadd.s32 16, %v1145_v1  ;;  %vm52_vm0 = vcmp.eq.s32.totalorder %v1145_v1, %v1148_v3  ;;  %v43_v12 = vadd.s32 24, %v1145_v1  ;;  %s1062_s8 = scalar_lea.vmem %s711_s7, 256  ;;  %p1067_p3 = scmp.lt.s32.totalorder %s711_s7, %s711_s7 }
  0x2c   :  { %v724_v7 = vsel %vm52_vm0, 1.0, %v1094_v6  ;;  %v1158_v19 = vpack.c.bf16 %v127_v16, %v124_v15  ;;  %v1160_v20 = vpack.c.bf16 %v133_v18, %v130_v17  ;;  %v44_v24 = vadd.s32 32, %v1145_v1  ;;  %p1063_p2 = scmp.ne.s32.totalorder %s711_s7, %s1062_s8  ;;  %p1068_p4 = scmp.lt.s32.totalorder %s1062_s8, %s1062_s8 }
  0x2d   :  { %vm53_vm1 = vcmp.eq.s32.totalorder %v41_v2, %v1148_v3  ;;  %84 = vxpose.xlu0.b32.start [1/8] (short) (narrow) %v724_v7, 16  ;;  %vm54_vm2 = vcmp.eq.s32.totalorder %v42_v4, %v1148_v3  ;;  %v1166_v28 = vsub.f32 %v77_v8, %v127_v16  ;;  %vm55_vm3 = vcmp.eq.s32.totalorder %v43_v12, %v1148_v3 }
  0x2e   :  { %v725_v11 = vsel %vm53_vm1, 1.0, %v1094_v6  ;;  %v726_v23 = vsel %vm54_vm2, 1.0, %v1094_v6  ;;  %955 = vmatprep.subr.bf16.mxu0 %v1158_v19  ;;  %907 = vmatprep.subr.bf16.mxu1 %v1158_v19  ;;  %v219_v29 = vand.u32 4294901760, %v1164_v27  ;;  %v1176_v31 = vpack.c.bf16 %v139_v22, %v136_v21  ;;  %p1069_p5 = por %p1068_p4, %p1067_p3 }
  0x2f   :  { %957 = vmatpush3.bf16.msra.mxu0 %v1158_v19  ;;  %909 = vmatpush3.bf16.msra.mxu1 %v1158_v19  ;;  %v226_v30 = vand.u32 4294901760, %v1166_v28  ;;  %v142_v32 = vand.u32 4294901760, %v82_v25  ;;  %v145_v33 = vand.u32 4294901760, %v83_v26  ;;  %v727_v34 = vsel %vm55_vm3, 1.0, %v1094_v6 }
  0x30   :  { %959 = vmatprep.subr.bf16.mxu0 %v1160_v20  ;;  %vm56_vm4 = vcmp.eq.s32.totalorder %v44_v24, %v1148_v3  ;;  %v45_v35 = vadd.s32 40, %v1145_v1  ;;  %911 = vmatprep.subr.bf16.mxu1 %v1160_v20  ;;  %v220_v36 = vsub.f32 %v1164_v27, %v219_v29  ;;  %v232_v38 = vsub.f32 %v78_v9, %v130_v17  ;;  %p1070_p6 = pnand %p1069_p5, %p1063_p2 }
  0x31   :  { %85 = vxpose.xlu0.b32.cont [2/8] (short) (narrow) %v725_v11, 16  ;;  %v227_v37 = vsub.f32 %v1166_v28, %v226_v30  ;;  %v239_v39 = vsub.f32 %v79_v10, %v133_v18  ;;  %v1187_v40 = vpack.c.bf16 %v145_v33, %v142_v32  ;;  %v728_v43 = vsel %vm56_vm4, 1.0, %v1094_v6 }
  0x32   :  { %v233_v41 = vand.u32 4294901760, %v232_v38  ;;  %v46_v44 = vadd.s32 48, %v1145_v1  ;;  %v221_v45 = vand.u32 4294901760, %v220_v36  ;;  %vm57_vm5 = vcmp.eq.s32.totalorder %v45_v35, %v1148_v3 }
  0x33   :  { %961 = vmatpush3.bf16.msra.mxu0 %v1160_v20  ;;  %913 = vmatpush3.bf16.msra.mxu1 %v1160_v20  ;;  %v240_v42 = vand.u32 4294901760, %v239_v39  ;;  %v228_v46 = vand.u32 4294901760, %v227_v37  ;;  %v246_v50 = vsub.f32 %v80_v13, %v136_v21  ;;  %v253_v51 = vsub.f32 %v81_v14, %v139_v22 }
  0x34   :  { %963 = vmatprep.subr.bf16.mxu0 %v1176_v31  ;;  %915 = vmatprep.subr.bf16.mxu1 %v1176_v31  ;;  %v234_v48 = vsub.f32 %v232_v38, %v233_v41  ;;  %v47_v52 = vadd.s32 56, %v1145_v1  ;;  %v970_v53 = vpack.c.bf16 %v226_v30, %v219_v29  ;;  %v729_v56 = vsel %vm57_vm5, 1.0, %v1094_v6 }
  0x35   :  { %86 = vxpose.xlu0.b32.cont [3/8] (short) (narrow) %v726_v23, 16  ;;  %v1193_v47 = vpack.c.bf16 %v240_v42, %v233_v41  ;;  %v241_v49 = vsub.f32 %v239_v39, %v240_v42  ;;  %v922_v57 = vpack.c.bf16 %v228_v46, %v221_v45  ;;  %v247_v58 = vand.u32 4294901760, %v246_v50 }
  0x36   :  { %v235_v54 = vand.u32 4294901760, %v234_v48  ;;  %v254_v59 = vand.u32 4294901760, %v253_v51  ;;  %vm58_vm6 = vcmp.eq.s32.totalorder %v46_v44, %v1148_v3  ;;  %v260_v61 = vsub.f32 %v82_v25, %v142_v32 }
  0x37   :  { %965 = vmatpush3.bf16.msra.mxu0 %v1176_v31  ;;  %917 = vmatpush3.bf16.msra.mxu1 %v1176_v31  ;;  %v242_v55 = vand.u32 4294901760, %v241_v49  ;;  %v267_v62 = vsub.f32 %v83_v26, %v145_v33  ;;  %v248_v0 = vsub.f32 %v246_v50, %v247_v58  ;;  %v730_v5 = vsel %vm58_vm6, 1.0, %v1094_v6 }
  0x38   :  { %967 = vmatprep.subr.bf16.mxu0 %v1187_v40  ;;  %919 = vmatprep.subr.bf16.mxu1 %v1187_v40  ;;  %v978_v63 = vpack.c.bf16 %v254_v59, %v247_v58  ;;  %v255_v1 = vsub.f32 %v253_v51, %v254_v59  ;;  %v261_v2 = vand.u32 4294901760, %v260_v61  ;;  %vm59_vm7 = vcmp.eq.s32.totalorder %v47_v52, %v1148_v3 }
  0x39   :  { %87 = vxpose.xlu0.b32.cont [4/8] (short) (narrow) %v727_v34, 16  ;;  %v926_v60 = vpack.c.bf16 %v242_v55, %v235_v54  ;;  %v268_v4 = vand.u32 4294901760, %v267_v62  ;;  %v249_v7 = vand.u32 4294901760, %v248_v0  ;;  %v731_v15 = vsel %vm59_vm7, 1.0, %v1094_v6 }
  0x3a   :  { %v256_v8 = vand.u32 4294901760, %v255_v1  ;;  %v262_v10 = vsub.f32 %v260_v61, %v261_v2  ;;  %v938_v17 = vpack.c.bf16 %v1166_v28, %v1164_v27  ;;  %v942_v18 = vpack.c.bf16 %v239_v39, %v232_v38 }
  0x3b   :  { %969 = vmatpush3.bf16.msra.mxu0 %v1187_v40  ;;  %921 = vmatpush3.bf16.msra.mxu1 %v1187_v40  ;;  %v982_v9 = vpack.c.bf16 %v268_v4, %v261_v2  ;;  %v269_v11 = vsub.f32 %v267_v62, %v268_v4  ;;  %v946_v21 = vpack.c.bf16 %v253_v51, %v246_v50 }
  0x3c   :  { %971 = vmatprep.subr.bf16.mxu0 %v970_v53  ;;  %923 = vmatprep.subr.bf16.mxu1 %v922_v57  ;;  %v930_v12 = vpack.c.bf16 %v256_v8, %v249_v7  ;;  %v263_v13 = vand.u32 4294901760, %v262_v10  ;;  %v950_v22 = vpack.c.bf16 %v267_v62, %v260_v61 }
  0x3d   :  { %88 = vxpose.xlu0.b32.cont [5/8] (short) (narrow) %v728_v43, 16  ;;  %v270_v14 = vand.u32 4294901760, %v269_v11 }
  0x3f   :  { %v934_v16 = vpack.c.bf16 %v270_v14, %v263_v13 }
  0x41   :  { %89 = vxpose.xlu0.b32.cont [6/8] (short) (narrow) %v729_v56, 16 }
  0x45   :  { %90 = vxpose.xlu0.b32.cont [7/8] (short) (narrow) %v730_v5, 16 }
  0x49   :  { %91 = vxpose.xlu0.b32.end [8/8] (short) (narrow) %v731_v15, 16 }
  0xad   :  { %v100_v23 = vpop.trf.xlu0 }
  0xae   :  { %v118_v3 = vsel %vm116_vm8, %v100_v23, 0 }
  0xaf   :  { %v196_v24 = vand.u32 4294901760, %v118_v3 }
  0xb1   :  { %v197_v25 = vsub.f32 %v118_v3, %v196_v24  ;;  %v101_v26 = vpop.trf.xlu0 }
  0xb2   :  { %v121_v29 = vsel %vm116_vm8, %v101_v26, 0 }
  0xb3   :  { %v206_v30 = vand.u32 4294901760, %v121_v29  ;;  %v198_v32 = vand.u32 4294901760, %v197_v25 }
  0xb5   :  { %v207_v33 = vsub.f32 %v121_v29, %v206_v30  ;;  %865 = vmatprep.mubr.f32.mxu0 %v198_v32  ;;  %v199_v6 = vsub.f32 %v197_v25, %v198_v32 }
  0xb7   :  { %v200_v34 = vand.u32 4294901760, %v199_v6  ;;  %v208_v35 = vand.u32 4294901760, %v207_v33 }
  0xb9   :  { %808 = vmatprep.mubr.f32.mxu1 %v200_v34  ;;  %866 = vmatmul.mubr.f32.vlgmr.msra.gmra.mrb[0].mxu0 %v208_v35  ;;  %v209_v27 = vsub.f32 %v207_v33, %v208_v35 }
  0xba   :  { %973 = vmatpush3.bf16.msra.mxu0 %v970_v53  ;;  %884 = vmatprep.mubr.f32.mxu0 %v196_v24 }
  0xbb   :  { %975 = vmatprep.subr.bf16.mxu0 %v1193_v47  ;;  %v210_v28 = vand.u32 4294901760, %v209_v27 }
  0xbd   :  { %809 = vmatmul.mubr.f32.vlgmr.msra.gmra.mrb[0].mxu1 %v210_v28 }
  0xbe   :  { %925 = vmatpush3.bf16.msra.mxu1 %v922_v57  ;;  %977 = vmatpush3.bf16.msra.mxu0 %v1193_v47 }
  0xbf   :  { %827 = vmatprep.mubr.f32.mxu1 %v196_v24  ;;  %927 = vmatprep.subr.bf16.mxu1 %v926_v60 }
  0xc0   :  { %979 = vmatprep.subr.bf16.mxu0 %v978_v63 }
  0xc2   :  { %929 = vmatpush3.bf16.msra.mxu1 %v926_v60  ;;  %981 = vmatpush3.bf16.msra.mxu0 %v978_v63 }
  0xc3   :  { %931 = vmatprep.subr.bf16.mxu1 %v930_v12  ;;  %983 = vmatprep.subr.bf16.mxu0 %v982_v9 }
  0xc6   :  { %933 = vmatpush3.bf16.msra.mxu1 %v930_v12  ;;  %985 = vmatpush3.bf16.msra.mxu0 %v982_v9 }
  0xc7   :  { %935 = vmatprep.subr.bf16.mxu1 %v934_v16  ;;  %987 = vmatprep.subr.bf16.mxu0 %v1158_v19 }
  0xc9   :  { %885 = vmatmul.mubr.f32.vlgmr.msra.gmra.mrb[0].mxu0 %v206_v30 }
  0xca   :  { %937 = vmatpush3.bf16.msra.mxu1 %v934_v16  ;;  %989 = vmatpush3.bf16.msra.mxu0 %v1158_v19 }
  0xcb   :  { %903 = vmatprep.mubr.f32.mxu0 %v196_v24  ;;  %939 = vmatprep.subr.bf16.mxu1 %v938_v17 }
  0xcc   :  { %991 = vmatprep.subr.bf16.mxu0 %v1160_v20 }
  0xcd   :  { %828 = vmatmul.mubr.f32.vlgmr.msra.gmra.mrb[0].mxu1 %v206_v30 }
  0xce   :  { %941 = vmatpush3.bf16.msra.mxu1 %v938_v17  ;;  %846 = vmatprep.mubr.f32.mxu1 %v197_v25 }
  0xcf   :  { %993 = vmatpush3.bf16.msra.mxu0 %v1160_v20  ;;  %943 = vmatprep.subr.bf16.mxu1 %v942_v18 }
  0xd0   :  { %995 = vmatprep.subr.bf16.mxu0 %v1176_v31 }
  0xd2   :  { %945 = vmatpush3.bf16.msra.mxu1 %v942_v18 }
  0xd3   :  { %997 = vmatpush3.bf16.msra.mxu0 %v1176_v31  ;;  %947 = vmatprep.subr.bf16.mxu1 %v946_v21 }
  0xd4   :  { %999 = vmatprep.subr.bf16.mxu0 %v1187_v40 }
  0xd6   :  { %949 = vmatpush3.bf16.msra.mxu1 %v946_v21 }
  0xd7   :  { %1001 = vmatpush3.bf16.msra.mxu0 %v1187_v40  ;;  %951 = vmatprep.subr.bf16.mxu1 %v950_v22 }
  0xda   :  { %904 = vmatmul.mubr.f32.vlgmr.msra.gmra.mrb[0].mxu0 %v206_v30  ;;  %953 = vmatpush3.bf16.msra.mxu1 %v950_v22 }
  0xdd   :  { %847 = vmatmul.mubr.f32.vlgmr.msra.gmra.mrb[0].mxu1 %v207_v33 }
 0x1ad   :  { %v905_v19 = vpop.f32.mrb[0].mxu0 }
 0x1ae   :  { %v693_v36 = vpop.f32.mrb[1].mxu0 }
 0x1b0   :  { %v848_v20 = vpop.f32.mrb[0].mxu1 }
 0x1b1   :  { %v1002_v37 = vadd.f32 %v905_v19, %v848_v20  ;;  %v417_v38 = vpop.f32.mrb[1].mxu1 }
 0x1b2   :  { %v1003_v39 = vadd.f32 %v693_v36, %v417_v38 }
 0x1b3   :  { %704 = vst [vmem:[#allocation7 + $0x8] sm:$0xff] %v1002_v37 }
 0x1b4   :  { %703 = vst [vmem:[#allocation7] sm:$0xff] %v1003_v39 }
 0x1b5   :  { %1073 = shalt.err (!%p1070_p6)
}
 0x1b6   :  { %s1074_s11 = scalar_lea.hbm %s1236_s2, 256 }
 0x1b7   :  { %p1075_p7 = scmp.ne.s32.totalorder %s1236_s2, %s1074_s11  ;;  %p1078_p8 = scmp.lt.u32.totalorder %s1074_s11, %s1236_s2 }
 0x1b9   :  { %p1080_p9 = pnand %p1078_p8, %p1075_p7 }
 0x1bb   :  { %1083 = shalt.err (!%p1080_p9)
}
 0x1bc   :  { %716 = dma.vmem_to_hbm [thread:$0]  %s711_s7, 256, %s1236_s2, [#allocation4], %s1092_s0, %s1092_s0, %s1093_s4  }
 0x1bd   :  { %1088 = dma.done.wait [#allocation4], 256  }
 0x1be   :  { %1089 = vsyncadd [#allocation4], 4294967040 }
 0x1bf   :  { %720 = vsyncpa [#allocation3], 1 }
 0x1c0   :  { %721 = vsyncpa [#allocation6], 1 }
 0x1c1   :  { %722 = vsyncpa [#allocation4], 1 }

</bundles_post_ra>
